<compile_context>
chip_gen: v7x
topology: tpu7x:2x2x1
jax: 0.10.0
libtpu: 0.0.40
codegen_flags: <defaults>
</compile_context>

<pallas_src>
import math
from functools import partial

import jax
import jax.numpy as jnp
from jax.experimental import pallas as pl
from jax.experimental.pallas import tpu as pltpu


# ------------------------------- kernel -------------------------------------


def _lcn_kernel(*refs, has_bias):
    # x_ref: (M, Bt, Nt)  -- m-th slab is the (batch, lane) tile for channel-pair m
    # w_ref: (M, Nt)      -- prescaled by 1/sqrt(C_in), lane axis n = o*D + d
    # b_ref: (1, Nt)      -- optional, prescaled by 0.1
    # o_ref: (Bt, Nt)
    if has_bias:
        x_ref, w_ref, b_ref, o_ref = refs
    else:
        x_ref, w_ref, o_ref = refs

    M = x_ref.shape[0]
    # Unrolled VPU multiply-accumulate over the (small, static) contraction axis.
    # f32 accumulator regardless of input dtype.
    acc = x_ref[0].astype(jnp.float32) * w_ref[0].astype(jnp.float32)[None, :]
    for m in range(1, M):
        acc = acc + x_ref[m].astype(jnp.float32) * w_ref[m].astype(jnp.float32)[None, :]

    if has_bias:
        acc = acc + b_ref[...].astype(jnp.float32)  # (1, Nt) broadcast over batch sublanes

    o_ref[...] = acc.astype(o_ref.dtype)


# ----------------------------- tile heuristics -------------------------------


def _pick_lane_tile(n):
    """Largest lane-dense tile (multiple of 128) dividing N, capped for VMEM."""
    if n % 128 != 0:
        return n  # full extent is always a legal block dim
    for cand in (2048, 1024, 512, 256, 128):
        if n % cand == 0:
            return cand
    return n


def _pick_batch_tile(b, m, nt, budget_bytes=6 * 1024 * 1024):
    """Batch rows per block so double-buffered x + out blocks fit a conservative
    VMEM budget (safe on v5e/v6e default scoped limits and v7x's 64 MiB/TC)."""
    per_row = 2 * (m + 1) * nt * 4  # f32, double-buffered x row + out row
    bt = max(1, budget_bytes // per_row)
    if bt >= b:
        return b
    bt = max(8, (bt // 8) * 8)  # sublane-aligned
    t = bt
    while t >= 8:  # prefer a divisor of B (no ragged final block)
        if b % t == 0:
            return t
        t -= 8
    return bt  # ragged final block is masked by Pallas


# ------------------------------- wrappers ------------------------------------


def lcn_prepare(weight, bias=None, *, s=2):
    """Init-time parameter prep (hoisted out of the per-call hot path):
    weight (C_out, C_in, D*s) -> wp (M, N) with m=c*s+k, n=o*D+d, scaled by
    1/sqrt(C_in); bias (1, C_out, D) -> bp (1, N) scaled by 0.1."""
    C_out, C_in, L = weight.shape
    assert L % s == 0
    D = L // s
    M, N = C_in * s, C_out * D
    wp = weight.reshape(C_out, C_in, D, s).transpose(1, 3, 0, 2).reshape(M, N)
    wp = wp.astype(jnp.float32) * (1.0 / math.sqrt(C_in))
    bp = None if bias is None else (bias.astype(jnp.float32) * 0.1).reshape(1, N)
    return {"wp": wp, "bp": bp, "C_out": C_out, "D": D, "s": s}


def lcn_forward(x, params):
    """x: (B, C_in, D*s) -> (B, C_out, D), matching the PyTorch forward."""
    s, C_out, D = params["s"], params["C_out"], params["D"]
    wp, bp = params["wp"], params["bp"]
    B, C_in, L = x.shape
    assert L == D * s
    M, N = C_in * s, C_out * D

    # Per-call x prep (XLA): de-interleave the (d, k) pairs and replicate over
    # C_out along the lane axis -> (M, B, N) so the kernel is pure lane-dense VPU.
    xr = x.reshape(B, C_in, D, s).transpose(1, 3, 0, 2).reshape(M, B, 1, D)
    xt = jnp.broadcast_to(xr, (M, B, C_out, D)).reshape(M, B, N)

    nt = _pick_lane_tile(N)
    bt = _pick_batch_tile(B, M, nt)
    grid = (pl.cdiv(B, bt), pl.cdiv(N, nt))

    has_bias = bp is not None
    # NOTE: weight/bias block indices are invariant along the batch grid axis, so
    # Pallas skips re-DMA between batch steps.  pipeline_mode=pl.Buffered(1) would
    # additionally halve their resident footprint; omitted for portability.
    in_specs = [
        pl.BlockSpec((M, bt, nt), lambda i, j: (0, i, j)),
        pl.BlockSpec((M, nt), lambda i, j: (0, j)),
    ]
    inputs = [xt, wp]
    if has_bias:
        in_specs.append(pl.BlockSpec((1, nt), lambda i, j: (0, j)))
        inputs.append(bp)

    out = pl.pallas_call(
        partial(_lcn_kernel, has_bias=has_bias),
        out_shape=jax.ShapeDtypeStruct((B, N), x.dtype),
        grid_spec=pltpu.PrefetchScalarGridSpec(
            num_scalar_prefetch=0,
            grid=grid,
            in_specs=in_specs,
            out_specs=pl.BlockSpec((bt, nt), lambda i, j: (i, j)),
        ),
        compiler_params=pltpu.CompilerParams(
            dimension_semantics=("parallel", "parallel"),
        ),
    )(*inputs)
    return out.reshape(B, C_out, D)


def lcn_reference(x, weight, bias=None):
    """Pure-JAX transcription of the PyTorch forward."""
    C_in = x.shape[1]
    xw = x[:, None, :, :] * weight[None]            # (B, C_out, C_in, L)
    xw = xw.reshape(*xw.shape[:-1], -1, 2)          # (B, C_out, C_in, D, 2)
    y = xw.sum(axis=(-1, -3)) / math.sqrt(C_in)     # (B, C_out, D)
    if bias is not None:
        y = y + bias * 0.1
    return y


# --------------------------------- demo --------------------------------------


if __name__ == "__main__":
    # Module config (s=2 implied by the forward's view(..., -1, 2)).
    B, C_in, C_out, out_dim, s = 2, 4, 8, 16, 2
    L = out_dim * s

    key = jax.random.PRNGKey(0)
    kx, kw, kb = jax.random.split(key, 3)
    x = jax.random.normal(kx, (B, C_in, L), dtype=jnp.float32)
    weight = jax.random.normal(kw, (C_out, C_in, L), dtype=jnp.float32)   # torch.randn-like
    bias = jax.random.normal(kb, (1, C_out, out_dim), dtype=jnp.float32)  # torch.randn-like

    # With bias
    params_b = lcn_prepare(weight, bias, s=s)
    out_b = jax.block_until_ready(lcn_forward(x, params_b))
    ref_b = lcn_reference(x, weight, bias)
    assert out_b.shape == (B, C_out, out_dim)
    assert jnp.allclose(out_b, ref_b, atol=1e-5, rtol=1e-5), "mismatch (bias=True)"

    # Without bias (module default) — bias-free kernel variant, no dummy buffer.
    params_nb = lcn_prepare(weight, None, s=s)
    out_nb = jax.block_until_ready(lcn_forward(x, params_nb))
    ref_nb = lcn_reference(x, weight, None)
    assert jnp.allclose(out_nb, ref_nb, atol=1e-5, rtol=1e-5), "mismatch (bias=False)"

    print("KERNEL_OK")
</pallas_src>

<mosaic_0001>
module attributes {stable_mosaic.version = 11 : i64} {
  func.func @_lcn_kernel(%arg0: i32, %arg1: i32, %arg2: memref<8x2x128xf32, #tpu.memory_space<vmem>>, %arg3: memref<8x128xf32, #tpu.memory_space<vmem>>, %arg4: memref<1x128xf32, #tpu.memory_space<vmem>>, %arg5: memref<2x128xf32, #tpu.memory_space<vmem>>) attributes {dimension_semantics = [#tpu.dimension_semantics<parallel>, #tpu.dimension_semantics<parallel>], iteration_bounds = array<i64: 1, 1>, scalar_prefetch = 0 : i64, scratch_operands = 0 : i64, tpu.core_type = #tpu.core_type<tc>, window_params = [{transform_indices = @transform_0, window_bounds = array<i64: 8, 2, 128>}, {transform_indices = @transform_1, window_bounds = array<i64: 8, 128>}, {transform_indices = @transform_2, window_bounds = array<i64: 1, 128>}, {transform_indices = @transform_3, window_bounds = array<i64: 2, 128>}]} {
    %c0 = arith.constant 0 : index
    %c0_0 = arith.constant 0 : index
    %c0_1 = arith.constant 0 : index
    %0 = vector.load %arg2[%c0, %c0_0, %c0_1] : memref<8x2x128xf32, #tpu.memory_space<vmem>>, vector<1x2x128xf32>
    %1 = vector.shape_cast %0 : vector<1x2x128xf32> to vector<2x128xf32>
    %c0_2 = arith.constant 0 : index
    %c0_3 = arith.constant 0 : index
    %2 = vector.load %arg3[%c0_2, %c0_3] : memref<8x128xf32, #tpu.memory_space<vmem>>, vector<1x128xf32>
    %3 = vector.shape_cast %2 : vector<1x128xf32> to vector<128xf32>
    %4 = vector.shape_cast %3 : vector<128xf32> to vector<1x128xf32>
    %5 = vector.broadcast %4 : vector<1x128xf32> to vector<2x128xf32>
    %6 = arith.mulf %1, %5 : vector<2x128xf32>
    %c1 = arith.constant 1 : index
    %c0_4 = arith.constant 0 : index
    %c0_5 = arith.constant 0 : index
    %7 = vector.load %arg2[%c1, %c0_4, %c0_5] : memref<8x2x128xf32, #tpu.memory_space<vmem>>, vector<1x2x128xf32>
    %8 = vector.shape_cast %7 : vector<1x2x128xf32> to vector<2x128xf32>
    %c1_6 = arith.constant 1 : index
    %c0_7 = arith.constant 0 : index
    %9 = vector.load %arg3[%c1_6, %c0_7] : memref<8x128xf32, #tpu.memory_space<vmem>>, vector<1x128xf32>
    %10 = vector.shape_cast %9 : vector<1x128xf32> to vector<128xf32>
    %11 = vector.shape_cast %10 : vector<128xf32> to vector<1x128xf32>
    %12 = vector.broadcast %11 : vector<1x128xf32> to vector<2x128xf32>
    %13 = arith.mulf %8, %12 : vector<2x128xf32>
    %14 = arith.addf %6, %13 : vector<2x128xf32>
    %c2 = arith.constant 2 : index
    %c0_8 = arith.constant 0 : index
    %c0_9 = arith.constant 0 : index
    %15 = vector.load %arg2[%c2, %c0_8, %c0_9] : memref<8x2x128xf32, #tpu.memory_space<vmem>>, vector<1x2x128xf32>
    %16 = vector.shape_cast %15 : vector<1x2x128xf32> to vector<2x128xf32>
    %c2_10 = arith.constant 2 : index
    %c0_11 = arith.constant 0 : index
    %17 = vector.load %arg3[%c2_10, %c0_11] : memref<8x128xf32, #tpu.memory_space<vmem>>, vector<1x128xf32>
    %18 = vector.shape_cast %17 : vector<1x128xf32> to vector<128xf32>
    %19 = vector.shape_cast %18 : vector<128xf32> to vector<1x128xf32>
    %20 = vector.broadcast %19 : vector<1x128xf32> to vector<2x128xf32>
    %21 = arith.mulf %16, %20 : vector<2x128xf32>
    %22 = arith.addf %14, %21 : vector<2x128xf32>
    %c3 = arith.constant 3 : index
    %c0_12 = arith.constant 0 : index
    %c0_13 = arith.constant 0 : index
    %23 = vector.load %arg2[%c3, %c0_12, %c0_13] : memref<8x2x128xf32, #tpu.memory_space<vmem>>, vector<1x2x128xf32>
    %24 = vector.shape_cast %23 : vector<1x2x128xf32> to vector<2x128xf32>
    %c3_14 = arith.constant 3 : index
    %c0_15 = arith.constant 0 : index
    %25 = vector.load %arg3[%c3_14, %c0_15] : memref<8x128xf32, #tpu.memory_space<vmem>>, vector<1x128xf32>
    %26 = vector.shape_cast %25 : vector<1x128xf32> to vector<128xf32>
    %27 = vector.shape_cast %26 : vector<128xf32> to vector<1x128xf32>
    %28 = vector.broadcast %27 : vector<1x128xf32> to vector<2x128xf32>
    %29 = arith.mulf %24, %28 : vector<2x128xf32>
    %30 = arith.addf %22, %29 : vector<2x128xf32>
    %c4 = arith.constant 4 : index
    %c0_16 = arith.constant 0 : index
    %c0_17 = arith.constant 0 : index
    %31 = vector.load %arg2[%c4, %c0_16, %c0_17] : memref<8x2x128xf32, #tpu.memory_space<vmem>>, vector<1x2x128xf32>
    %32 = vector.shape_cast %31 : vector<1x2x128xf32> to vector<2x128xf32>
    %c4_18 = arith.constant 4 : index
    %c0_19 = arith.constant 0 : index
    %33 = vector.load %arg3[%c4_18, %c0_19] : memref<8x128xf32, #tpu.memory_space<vmem>>, vector<1x128xf32>
    %34 = vector.shape_cast %33 : vector<1x128xf32> to vector<128xf32>
    %35 = vector.shape_cast %34 : vector<128xf32> to vector<1x128xf32>
    %36 = vector.broadcast %35 : vector<1x128xf32> to vector<2x128xf32>
    %37 = arith.mulf %32, %36 : vector<2x128xf32>
    %38 = arith.addf %30, %37 : vector<2x128xf32>
    %c5 = arith.constant 5 : index
    %c0_20 = arith.constant 0 : index
    %c0_21 = arith.constant 0 : index
    %39 = vector.load %arg2[%c5, %c0_20, %c0_21] : memref<8x2x128xf32, #tpu.memory_space<vmem>>, vector<1x2x128xf32>
    %40 = vector.shape_cast %39 : vector<1x2x128xf32> to vector<2x128xf32>
    %c5_22 = arith.constant 5 : index
    %c0_23 = arith.constant 0 : index
    %41 = vector.load %arg3[%c5_22, %c0_23] : memref<8x128xf32, #tpu.memory_space<vmem>>, vector<1x128xf32>
    %42 = vector.shape_cast %41 : vector<1x128xf32> to vector<128xf32>
    %43 = vector.shape_cast %42 : vector<128xf32> to vector<1x128xf32>
    %44 = vector.broadcast %43 : vector<1x128xf32> to vector<2x128xf32>
    %45 = arith.mulf %40, %44 : vector<2x128xf32>
    %46 = arith.addf %38, %45 : vector<2x128xf32>
    %c6 = arith.constant 6 : index
    %c0_24 = arith.constant 0 : index
    %c0_25 = arith.constant 0 : index
    %47 = vector.load %arg2[%c6, %c0_24, %c0_25] : memref<8x2x128xf32, #tpu.memory_space<vmem>>, vector<1x2x128xf32>
    %48 = vector.shape_cast %47 : vector<1x2x128xf32> to vector<2x128xf32>
    %c6_26 = arith.constant 6 : index
    %c0_27 = arith.constant 0 : index
    %49 = vector.load %arg3[%c6_26, %c0_27] : memref<8x128xf32, #tpu.memory_space<vmem>>, vector<1x128xf32>
    %50 = vector.shape_cast %49 : vector<1x128xf32> to vector<128xf32>
    %51 = vector.shape_cast %50 : vector<128xf32> to vector<1x128xf32>
    %52 = vector.broadcast %51 : vector<1x128xf32> to vector<2x128xf32>
    %53 = arith.mulf %48, %52 : vector<2x128xf32>
    %54 = arith.addf %46, %53 : vector<2x128xf32>
    %c7 = arith.constant 7 : index
    %c0_28 = arith.constant 0 : index
    %c0_29 = arith.constant 0 : index
    %55 = vector.load %arg2[%c7, %c0_28, %c0_29] : memref<8x2x128xf32, #tpu.memory_space<vmem>>, vector<1x2x128xf32>
    %56 = vector.shape_cast %55 : vector<1x2x128xf32> to vector<2x128xf32>
    %c7_30 = arith.constant 7 : index
    %c0_31 = arith.constant 0 : index
    %57 = vector.load %arg3[%c7_30, %c0_31] : memref<8x128xf32, #tpu.memory_space<vmem>>, vector<1x128xf32>
    %58 = vector.shape_cast %57 : vector<1x128xf32> to vector<128xf32>
    %59 = vector.shape_cast %58 : vector<128xf32> to vector<1x128xf32>
    %60 = vector.broadcast %59 : vector<1x128xf32> to vector<2x128xf32>
    %61 = arith.mulf %56, %60 : vector<2x128xf32>
    %62 = arith.addf %54, %61 : vector<2x128xf32>
    %c0_32 = arith.constant 0 : index
    %c0_33 = arith.constant 0 : index
    %63 = vector.load %arg4[%c0_32, %c0_33] : memref<1x128xf32, #tpu.memory_space<vmem>>, vector<1x128xf32>
    %64 = vector.broadcast %63 : vector<1x128xf32> to vector<2x128xf32>
    %65 = arith.addf %62, %64 : vector<2x128xf32>
    %c0_34 = arith.constant 0 : index
    %c0_35 = arith.constant 0 : index
    %66 = vector.load %arg5[%c0_34, %c0_35] : memref<2x128xf32, #tpu.memory_space<vmem>>, vector<2x128xf32>
    tpu.vector_store %arg5[%c0_34, %c0_35], %65 {strides = array<i32>} : memref<2x128xf32, #tpu.memory_space<vmem>>, vector<2x128xf32>,
    return
  }
  func.func @transform_0(%arg0: i32, %arg1: i32) -> (i32, i32, i32) {
    %c0_i32 = arith.constant 0 : i32
    %c0_i32_0 = arith.constant 0 : i32
    return %c0_i32, %arg0, %arg1 : i32, i32, i32
  }
  func.func @transform_1(%arg0: i32, %arg1: i32) -> (i32, i32) {
    %c0_i32 = arith.constant 0 : i32
    %c0_i32_0 = arith.constant 0 : i32
    return %c0_i32, %arg1 : i32, i32
  }
  func.func @transform_2(%arg0: i32, %arg1: i32) -> (i32, i32) {
    %c0_i32 = arith.constant 0 : i32
    %c0_i32_0 = arith.constant 0 : i32
    return %c0_i32, %arg1 : i32, i32
  }
  func.func @transform_3(%arg0: i32, %arg1: i32) -> (i32, i32) {
    %c0_i32 = arith.constant 0 : i32
    return %arg0, %arg1 : i32, i32
  }
}

</mosaic_0001>

<bundles_post_ra>
// kernel: tpu_custom_call.1
= control target key start
LH: loop header
LB: loop body
LE: loop exit
PB: predicated region body
PF: predicated region fallthrough
CT: control target
= control target key end

     0   :  { %8 = vsyncpa [#allocation3], 0  ;;  %s286_s0 = inlined_call_operand.hbm [shape: f32[8,2,128], index: 0, kind: input, shape index: {}]   ;;  %s287_s1 = inlined_call_operand.hbm [shape: f32[8,128], index: 1, kind: input, shape index: {}]   ;;  %s288_s2 = inlined_call_operand.vmem [shape: f32[1,128], index: 2, kind: input, shape index: {}]   ;;  %s289_s3 = inlined_call_operand.hbm [shape: f32[2,128], index: 3, kind: output, shape index: {}]  }
   0x1   :  { %9 = vsyncpa [#allocation6], 0 }
   0x2   :  { %10 = vsyncpa [#allocation4], 0  ;;  %s222_s12 = smov [#allocation2]   ;;  %s150_s16 = scalar_lea.hbm %s286_s0, 256 }
   0x3   :  { %s16_s13 = sshll.u32 %s222_s12, 4  ;;  %p151_p0 = scmp.ne.s32.totalorder %s286_s0, %s150_s16  ;;  %s17_s13 = int_to_ptr.vmem [resolvable:$true] %s16_s13 }
   0x4   :  { %p154_p1 = scmp.lt.u32.totalorder %s150_s16, %s286_s0 }
   0x6   :  { %p156_p2 = pnand %p154_p1, %p151_p0 }
   0x8   :  { %159 = shalt.err (!%p156_p2)
}
   0x9   :  { %s160_s21 = scalar_lea.vmem %s17_s13, 256  ;;  %p165_p4 = scmp.lt.s32.totalorder %s17_s13, %s17_s13 }
   0xa   :  { %p161_p3 = scmp.ne.s32.totalorder %s17_s13, %s160_s21  ;;  %p166_p5 = scmp.lt.s32.totalorder %s160_s21, %s160_s21 }
   0xc   :  { %p167_p6 = por %p166_p5, %p165_p4 }
   0xe   :  { %p168_p7 = pnand %p167_p6, %p161_p3 }
  0x10   :  { %171 = shalt.err (!%p168_p7)
}
  0x11   :  { %s223_s22 = smov 32   ;;  %s224_s23 = smov 2  }
  0x12   :  { %22 = dma.hbm_to_vmem [thread:$0]  %s286_s0, 256, %s17_s13, [#allocation3], %s223_s22, %s223_s22, %s224_s23  }
  0x13   :  { %s225_s26 = smov [#allocation5]   ;;  %s172_s30 = scalar_lea.hbm %s287_s1, 128 }
  0x14   :  { %s29_s27 = sshll.u32 %s225_s26, 4  ;;  %p173_p8 = scmp.ne.s32.totalorder %s287_s1, %s172_s30  ;;  %s30_s27 = int_to_ptr.vmem [resolvable:$true] %s29_s27 }
  0x15   :  { %p176_p9 = scmp.lt.u32.totalorder %s172_s30, %s287_s1 }
  0x17   :  { %p178_p10 = pnand %p176_p9, %p173_p8 }
  0x19   :  { %181 = shalt.err (!%p178_p10)
}
  0x1a   :  { %s182_s8 = scalar_lea.vmem %s30_s27, 128  ;;  %p187_p12 = scmp.lt.s32.totalorder %s30_s27, %s30_s27 }
  0x1b   :  { %p183_p11 = scmp.ne.s32.totalorder %s30_s27, %s182_s8  ;;  %p188_p13 = scmp.lt.s32.totalorder %s182_s8, %s182_s8 }
  0x1d   :  { %p189_p0 = por %p188_p13, %p187_p12 }
  0x1f   :  { %p190_p1 = pnand %p189_p0, %p183_p11 }
  0x21   :  { %193 = shalt.err (!%p190_p1)
}
  0x22   :  { %32 = dma.hbm_to_vmem [thread:$0]  %s287_s1, 128, %s30_s27, [#allocation6]  }
  0x23   :  { %216 = dma.done.wait [#allocation3], 256  }
  0x24   :  { %217 = vsyncadd [#allocation3], 4294967040 }
  0x25   :  { %218 = dma.done.wait [#allocation6], 128  }
  0x26   :  { %219 = vsyncadd [#allocation6], 4294967168  ;;  %v41_v0 = vld [vmem:[#allocation2] sm:$0x3]  ;;  %v136_v1 = vld [vmem:[#allocation5] ss:$0 sm:$0xff] }
  0x27   :  { %v49_v2 = vld [vmem:[#allocation2 + $0x2] sm:$0x3]  ;;  %v47_v3 = vmul.f32 %v136_v1, %v41_v0  ;;  %v137_v4 = vld [vmem:[#allocation5 + $0x1] ss:$0 sm:$0xff]  ;;  %v58_v5 = vld [vmem:[#allocation2 + $0x4] sm:$0x3] }
  0x28   :  { %v138_v6 = vld [vmem:[#allocation5 + $0x2] ss:$0 sm:$0xff]  ;;  %v55_v7 = vmul.f32 %v137_v4, %v49_v2  ;;  %v67_v9 = vld [vmem:[#allocation2 + $0x6] sm:$0x3]  ;;  %v139_v10 = vld [vmem:[#allocation5 + $0x3] ss:$0 sm:$0xff] }
  0x29   :  { %v64_v8 = vmul.f32 %v138_v6, %v58_v5  ;;  %v76_v11 = vld [vmem:[#allocation2 + $0x8] sm:$0x3]  ;;  %v140_v12 = vld [vmem:[#allocation5 + $0x4] ss:$0 sm:$0xff]  ;;  %v73_v14 = vmul.f32 %v139_v10, %v67_v9  ;;  %v85_v15 = vld [vmem:[#allocation2 + $0xa] sm:$0x3] }
  0x2a   :  { %v56_v13 = vadd.f32 %v55_v7, %v47_v3  ;;  %v141_v16 = vld [vmem:[#allocation5 + $0x5] ss:$0 sm:$0xff]  ;;  %v82_v18 = vmul.f32 %v140_v12, %v76_v11  ;;  %v94_v19 = vld [vmem:[#allocation2 + $0xc] sm:$0x3]  ;;  %v142_v20 = vld [vmem:[#allocation5 + $0x6] ss:$0 sm:$0xff] }
  0x2b   :  { %v91_v22 = vmul.f32 %v141_v16, %v85_v15  ;;  %v103_v23 = vld [vmem:[#allocation2 + $0xe] sm:$0x3]  ;;  %v143_v24 = vld [vmem:[#allocation5 + $0x7] ss:$0 sm:$0xff]  ;;  %v100_v26 = vmul.f32 %v142_v20, %v94_v19  ;;  %v144_v30 = vld [vmem:[%s288_s2] ss:$0 sm:$0xff] }
  0x2c   :  { %v65_v17 = vadd.f32 %v64_v8, %v56_v13  ;;  %v109_v28 = vmul.f32 %v143_v24, %v103_v23  ;;  %s226_s11 = smov [#allocation7]  }
  0x2d   :  { %s126_s12 = sshll.u32 %s226_s11, 4  ;;  %s127_s12 = int_to_ptr.vmem [resolvable:$true] %s126_s12 }
  0x2e   :  { %v74_v21 = vadd.f32 %v73_v14, %v65_v17  ;;  %s194_s13 = scalar_lea.vmem %s127_s12, 32  ;;  %p199_p3 = scmp.lt.s32.totalorder %s127_s12, %s127_s12 }
  0x2f   :  { %p195_p2 = scmp.ne.s32.totalorder %s127_s12, %s194_s13  ;;  %p200_p4 = scmp.lt.s32.totalorder %s194_s13, %s194_s13 }
  0x30   :  { %v83_v25 = vadd.f32 %v82_v18, %v74_v21 }
  0x31   :  { %p201_p5 = por %p200_p4, %p199_p3 }
  0x32   :  { %v92_v27 = vadd.f32 %v91_v22, %v83_v25 }
  0x33   :  { %p202_p6 = pnand %p201_p5, %p195_p2 }
  0x34   :  { %v101_v29 = vadd.f32 %v100_v26, %v92_v27 }
  0x36   :  { %v110_v31 = vadd.f32 %v109_v28, %v101_v29 }
  0x38   :  { %v118_v32 = vadd.f32 %v144_v30, %v110_v31 }
  0x3a   :  { %119 = vst [vmem:[#allocation7] sm:$0x3] %v118_v32 }
  0x3b   :  { %205 = shalt.err (!%p202_p6)
}
  0x3c   :  { %s206_s16 = scalar_lea.hbm %s289_s3, 32 }
  0x3d   :  { %p207_p7 = scmp.ne.s32.totalorder %s289_s3, %s206_s16  ;;  %p210_p8 = scmp.lt.u32.totalorder %s206_s16, %s289_s3 }
  0x3f   :  { %p212_p9 = pnand %p210_p8, %p207_p7 }
  0x41   :  { %215 = shalt.err (!%p212_p9)
}
  0x42   :  { %129 = dma.vmem_to_hbm [thread:$0]  %s127_s12, 32, %s289_s3, [#allocation4]  }
  0x43   :  { %220 = dma.done.wait [#allocation4], 32  }
  0x44   :  { %221 = vsyncadd [#allocation4], 4294967264 }
  0x45   :  { %133 = vsyncpa [#allocation3], 1 }
  0x46   :  { %134 = vsyncpa [#allocation6], 1 }
  0x47   :  { %135 = vsyncpa [#allocation4], 1 }

</bundles_post_ra>
